<compile_context>
chip_gen: v5e
topology: v5e:2x2
jax: 0.10.0
libtpu: 0.0.40
codegen_flags: <defaults>
</compile_context>

<pallas_src>
import functools

import jax
import jax.numpy as jnp
from jax import lax
from jax.experimental import pallas as pl
from jax.experimental.pallas import tpu as pltpu

EPS = 1e-5


# --------------------------------- kernel -----------------------------------

def _encode_block_kernel(x_ref, g1_ref, b1_ref, pc1_ref, wb1_ref,
                         g2_ref, b2_ref, pc2_ref, wb2_ref, cb2_ref,
                         o_ref, *, H, inv_count):
    # x_ref : (N*H, W*Cin)          lane-dense input slab
    # wb*   : (3, W*C, W*Cout)      banded conv weights, one block per kh tap
    # pc*   : (W*C, W*C)            channel-fold indicator matrices (0/1)
    # g/b/cb: (1, W*C)              BN gamma/beta and conv2 bias, tiled over w
    # o_ref : (N*H, W*Cout)         lane-dense output slab (full 128-lane stores)
    NH = x_ref.shape[0]

    # Border-row index computed ONCE; (NH, 1) column broadcast inside jnp.where.
    h_idx = lax.broadcasted_iota(jnp.int32, (NH, 1), 0) % H
    is_top = h_idx == 0
    is_bot = h_idx == H - 1

    def shift_rows(a, direction):
        # direction=+1: row (n,h) <- original (n,h-1); zeros at h == 0
        # direction=-1: row (n,h) <- original (n,h+1); zeros at h == H-1
        # Rows are n-major / h-minor, so a circular sublane roll + border mask
        # is exact (only the masked border rows wrap).
        rolled = pltpu.roll(a, shift=direction % NH, axis=0)
        return jnp.where(is_top if direction == 1 else is_bot, 0.0, rolled)

    def bn_tanh(a, pc_ref, gamma, beta):
        # Reduce first, then fold channels with a tiny (1,WC)@(WC,WC) matmul:
        # stats cost no longer scales with NH; everything stays lane-dense.
        s = jnp.sum(a, axis=0, keepdims=True)
        mu = jnp.dot(s, pc_ref[...],
                     preferred_element_type=jnp.float32) * inv_count
        xc = a - mu
        sq = jnp.sum(xc * xc, axis=0, keepdims=True)
        var = jnp.dot(sq, pc_ref[...],
                      preferred_element_type=jnp.float32) * inv_count
        return jnp.tanh(xc * lax.rsqrt(var + EPS) * gamma + beta)

    def conv3x3(h, wb_ref, bias=None):
        # Three accumulated per-tap dots: no (NH, 3*W*C) im2col slab is built;
        # the horizontal (W) zero padding is folded into the banded weights.
        acc = jnp.dot(shift_rows(h, 1), wb_ref[0],
                      preferred_element_type=jnp.float32)
        acc = acc + jnp.dot(h, wb_ref[1], preferred_element_type=jnp.float32)
        acc = acc + jnp.dot(shift_rows(h, -1), wb_ref[2],
                            preferred_element_type=jnp.float32)
        if bias is not None:
            acc = acc + bias
        return acc

    # --- BatchNorm2d(n_in_ch) + Tanh.  TODO(synk): Dropout2d -> identity. ----
    h1 = bn_tanh(x_ref[...], pc1_ref, g1_ref[...], b1_ref[...])

    # --- Conv2d(n_in_ch -> n_ch, 3x3, pad=1).  Bias dropped: a per-channel ----
    # constant is exactly cancelled by the following training-mode BatchNorm.
    a1 = conv3x3(h1, wb1_ref)

    # --- BatchNorm2d(n_ch) + Tanh.  TODO(synk): Dropout2d -> identity. --------
    h2 = bn_tanh(a1, pc2_ref, g2_ref[...], b2_ref[...])

    # --- Conv2d(n_ch -> n_ch, 3x3, pad=1) + bias: full-width lane-dense store.
    o_ref[...] = conv3x3(h2, wb2_ref, bias=cb2_ref[...])


# ----------------------------- wrapper helpers -------------------------------

def _channel_fold(C, W):
    """(W*C, W*C) indicator matrix M with M[i, j] = 1 iff i % C == j % C."""
    idx = jnp.arange(W * C) % C
    return (idx[:, None] == idx[None, :]).astype(jnp.float32)


def _band_weight(w_oihw, W):
    """OIHW 3x3 conv weights -> banded (3, W*Cin, W*Cout) blocks (one per kh).

    In block kh, row (w_in, ci), column (w_out, co) holds
    w[co, ci, kh, w_in - w_out + 1] when |w_in - w_out| <= 1, else 0.  The
    missing out-of-range terms implement the W-direction zero padding.
    NOTE: this does W/3x redundant MACs vs. a true 3x3 conv and grows O(W^2);
    fine at W=16, tile W into band blocks before scaling (esp. on v7x VMEM).
    """
    Cout, Cin, KH, KW = w_oihw.shape
    wk = jnp.transpose(w_oihw, (2, 3, 1, 0)).astype(jnp.float32)  # (KH,KW,Cin,Cout)
    w_idx = jnp.arange(W)
    blocks = []
    for kh in range(KH):
        m = jnp.zeros((W, Cin, W, Cout), jnp.float32)
        for kw in range(KW):
            band = (w_idx[:, None] == (w_idx[None, :] + kw - 1)).astype(jnp.float32)
            m = m + band[:, None, :, None] * wk[kh, kw][None, :, None, :]
        blocks.append(m.reshape(W * Cin, W * Cout))
    return jnp.stack(blocks, axis=0)


def _tile_w(p, W):
    """(1, C) per-channel parameter -> (1, W*C) tiled onto the lane layout."""
    return jnp.tile(p.reshape(1, -1).astype(jnp.float32), (1, W))


def prepare_encode_block_params(params, W):
    """Build all derived arrays ONCE (they depend only on the weights and W).

    Cache the result alongside the parameters; the per-call path is then just
    the NCHW<->lane-dense repack plus a single pallas_call.
    """
    Cin = params["w1"].shape[1]
    Cout = params["w1"].shape[0]
    return {
        "g1": _tile_w(params["bn1_g"], W),
        "b1": _tile_w(params["bn1_b"], W),
        "pc1": _channel_fold(Cin, W),
        "wb1": _band_weight(params["w1"], W),      # (3, W*Cin,  W*Cout)
        "g2": _tile_w(params["bn2_g"], W),
        "b2": _tile_w(params["bn2_b"], W),
        "pc2": _channel_fold(Cout, W),
        "wb2": _band_weight(params["w2"], W),      # (3, W*Cout, W*Cout)
        "cb2": _tile_w(params["c2_b"], W),
        # params["c1_b"] intentionally unused: conv1 bias is exactly cancelled
        # by the following training-mode BatchNorm.
    }


@jax.jit
def encode_block_pallas(x_nchw, prep):
    """x_nchw: (N, Cin, H, W) float32, Cin = n_ch // 2. Returns (N, n_ch, H, W)."""
    N, Cin, H, W = x_nchw.shape
    Cout = prep["cb2"].shape[1] // W
    NH = N * H
    inv_count = 1.0 / float(N * H * W)

    # Single cheap repack NCHW -> lane-dense (N*H, W*Cin); the kernel emits a
    # lane-dense (N*H, W*Cout) slab so the reverse repack is equally cheap.
    x_slab = (jnp.transpose(x_nchw, (0, 2, 3, 1)).astype(jnp.float32)
              .reshape(NH, W * Cin))

    vmem = pl.BlockSpec(memory_space=pltpu.MemorySpace.VMEM)
    out_slab = pl.pallas_call(
        functools.partial(_encode_block_kernel, H=H, inv_count=inv_count),
        out_shape=jax.ShapeDtypeStruct((NH, W * Cout), jnp.float32),
        in_specs=[vmem] * 10,
        out_specs=vmem,
    )(x_slab, prep["g1"], prep["b1"], prep["pc1"], prep["wb1"],
      prep["g2"], prep["b2"], prep["pc2"], prep["wb2"], prep["cb2"])

    return jnp.transpose(out_slab.reshape(N, H, W, Cout), (0, 3, 1, 2))


# ----------------------------- reference & test -------------------------------

def encode_block_reference(x, params):
    """Pure-JAX reference (NCHW, train-mode BN / identity dropout semantics)."""
    def bn(h, g, b):
        mu = jnp.mean(h, axis=(0, 2, 3), keepdims=True)
        var = jnp.mean((h - mu) ** 2, axis=(0, 2, 3), keepdims=True)
        return (h - mu) / jnp.sqrt(var + EPS) * g.reshape(1, -1, 1, 1) \
            + b.reshape(1, -1, 1, 1)

    def conv(h, w, b):
        y = lax.conv_general_dilated(
            h, w, window_strides=(1, 1), padding="SAME",
            dimension_numbers=("NCHW", "OIHW", "NCHW"),
            precision=lax.Precision.HIGHEST)
        return y + b.reshape(1, -1, 1, 1)

    h = jnp.tanh(bn(x, params["bn1_g"], params["bn1_b"]))
    h = conv(h, params["w1"], params["c1_b"])
    h = jnp.tanh(bn(h, params["bn2_g"], params["bn2_b"]))
    return conv(h, params["w2"], params["c2_b"])


def make_params(key, n_ch):
    n_in = n_ch // 2
    ks = jax.random.split(key, 8)
    fan1 = 1.0 / jnp.sqrt(n_in * 9.0)
    fan2 = 1.0 / jnp.sqrt(n_ch * 9.0)
    return {
        "bn1_g": jax.random.uniform(ks[0], (1, n_in), jnp.float32, 0.5, 1.5),
        "bn1_b": 0.1 * jax.random.normal(ks[1], (1, n_in), jnp.float32),
        "w1": fan1 * jax.random.normal(ks[2], (n_ch, n_in, 3, 3), jnp.float32),
        "c1_b": 0.1 * jax.random.normal(ks[3], (1, n_ch), jnp.float32),
        "bn2_g": jax.random.uniform(ks[4], (1, n_ch), jnp.float32, 0.5, 1.5),
        "bn2_b": 0.1 * jax.random.normal(ks[5], (1, n_ch), jnp.float32),
        "w2": fan2 * jax.random.normal(ks[6], (n_ch, n_ch, 3, 3), jnp.float32),
        "c2_b": 0.1 * jax.random.normal(ks[7], (1, n_ch), jnp.float32),
    }


if __name__ == "__main__":
    key = jax.random.PRNGKey(0)
    k_x, k_p = jax.random.split(key)

    N, n_ch, H, W = 2, 8, 16, 16          # n_in_ch = 4
    x = jax.random.normal(k_x, (N, n_ch // 2, H, W), jnp.float32)
    params = make_params(k_p, n_ch)

    # Derived arrays built once (cache them with the params in real use).
    prep = prepare_encode_block_params(params, W)

    out = encode_block_pallas(x, prep)
    out = jax.block_until_ready(out)

    ref = encode_block_reference(x, params)
    assert out.shape == (N, n_ch, H, W), out.shape
    err = float(jnp.max(jnp.abs(out - ref)))
    assert jnp.allclose(out, ref, atol=1e-3, rtol=1e-3), err

    print("KERNEL_OK")
</pallas_src>

<mosaic_0001>
module attributes {stable_mosaic.version = 11 : i64} {
  func.func @_encode_block_kernel(%arg0: memref<32x64xf32, #tpu.memory_space<vmem>>, %arg1: memref<1x64xf32, #tpu.memory_space<vmem>>, %arg2: memref<1x64xf32, #tpu.memory_space<vmem>>, %arg3: memref<64x64xf32, #tpu.memory_space<vmem>>, %arg4: memref<3x64x128xf32, #tpu.memory_space<vmem>>, %arg5: memref<1x128xf32, #tpu.memory_space<vmem>>, %arg6: memref<1x128xf32, #tpu.memory_space<vmem>>, %arg7: memref<128x128xf32, #tpu.memory_space<vmem>>, %arg8: memref<3x128x128xf32, #tpu.memory_space<vmem>>, %arg9: memref<1x128xf32, #tpu.memory_space<vmem>>, %arg10: memref<32x128xf32, #tpu.memory_space<vmem>>) attributes {dimension_semantics = [], scalar_prefetch = 0 : i64, scratch_operands = 0 : i64, tpu.core_type = #tpu.core_type<tc>} {
    %0 = tpu.iota {dimensions = array<i32: 0>} : vector<32x1xi32>
    %c16_i32 = arith.constant 16 : i32
    %c0_i32 = arith.constant 0 : i32
    %1 = arith.cmpi eq, %c16_i32, %c0_i32 : i32
    %c1_i32 = arith.constant 1 : i32
    %2 = arith.select %1, %c1_i32, %c16_i32 : i32
    %3 = vector.broadcast %2 : i32 to vector<32x1xi32>
    %4 = arith.remsi %0, %3 : vector<32x1xi32>
    %c0_i32_0 = arith.constant 0 : i32
    %5 = vector.broadcast %c0_i32_0 : i32 to vector<32x1xi32>
    %6 = arith.cmpi ne, %4, %5 : vector<32x1xi32>
    %c0_i32_1 = arith.constant 0 : i32
    %7 = vector.broadcast %c0_i32_1 : i32 to vector<32x1xi32>
    %8 = arith.cmpi slt, %4, %7 : vector<32x1xi32>
    %c0_i32_2 = arith.constant 0 : i32
    %9 = arith.cmpi slt, %2, %c0_i32_2 : i32
    %10 = vector.broadcast %9 : i1 to vector<32x1xi1>
    %11 = vector.broadcast %10 : vector<32x1xi1> to vector<32x1xi1>
    %12 = arith.xori %8, %11 : vector<32x1xi1>
    %13 = arith.andi %12, %6 : vector<32x1xi1>
    %14 = vector.broadcast %2 : i32 to vector<32x1xi32>
    %15 = arith.addi %4, %14 : vector<32x1xi32>
    %16 = arith.select %13, %15, %4 : vector<32x1xi1>, vector<32x1xi32>
    %c0_i32_3 = arith.constant 0 : i32
    %17 = vector.broadcast %c0_i32_3 : i32 to vector<32x1xi32>
    %18 = arith.cmpi eq, %16, %17 : vector<32x1xi32>
    %c15_i32 = arith.constant 15 : i32
    %19 = vector.broadcast %c15_i32 : i32 to vector<32x1xi32>
    %20 = arith.cmpi eq, %16, %19 : vector<32x1xi32>
    %c0 = arith.constant 0 : index
    %c0_4 = arith.constant 0 : index
    %21 = vector.load %arg0[%c0, %c0_4] : memref<32x64xf32, #tpu.memory_space<vmem>>, vector<32x64xf32>
    %c0_5 = arith.constant 0 : index
    %c0_6 = arith.constant 0 : index
    %22 = vector.load %arg1[%c0_5, %c0_6] : memref<1x64xf32, #tpu.memory_space<vmem>>, vector<1x64xf32>
    %c0_7 = arith.constant 0 : index
    %c0_8 = arith.constant 0 : index
    %23 = vector.load %arg2[%c0_7, %c0_8] : memref<1x64xf32, #tpu.memory_space<vmem>>, vector<1x64xf32>
    %cst = arith.constant dense<0.000000e+00> : vector<64xf32>
    %24 = vector.multi_reduction <add>, %21, %cst [0] : vector<32x64xf32> to vector<64xf32>
    %25 = vector.shape_cast %24 : vector<64xf32> to vector<1x64xf32>
    %c0_9 = arith.constant 0 : index
    %c0_10 = arith.constant 0 : index
    %26 = vector.load %arg3[%c0_9, %c0_10] : memref<64x64xf32, #tpu.memory_space<vmem>>, vector<64x64xf32>
    %cst_11 = arith.constant dense<0.000000e+00> : vector<1x64xf32>
    %27 = tpu.matmul %25, %26, %cst_11 {dimension_numbers = #tpu.dot_dimension_numbers<[1], [0], [0], [1], [0, 0, 1, 1], [], []>} : vector<1x64xf32>, vector<64x64xf32>, vector<1x64xf32> -> vector<1x64xf32>
    %cst_12 = arith.constant 0.001953125 : f32
    %28 = vector.broadcast %cst_12 : f32 to vector<1x64xf32>
    %29 = arith.mulf %27, %28 : vector<1x64xf32>
    %30 = vector.broadcast %29 : vector<1x64xf32> to vector<32x64xf32>
    %31 = arith.subf %21, %30 : vector<32x64xf32>
    %32 = arith.mulf %31, %31 : vector<32x64xf32>
    %cst_13 = arith.constant dense<0.000000e+00> : vector<64xf32>
    %33 = vector.multi_reduction <add>, %32, %cst_13 [0] : vector<32x64xf32> to vector<64xf32>
    %34 = vector.shape_cast %33 : vector<64xf32> to vector<1x64xf32>
    %c0_14 = arith.constant 0 : index
    %c0_15 = arith.constant 0 : index
    %35 = vector.load %arg3[%c0_14, %c0_15] : memref<64x64xf32, #tpu.memory_space<vmem>>, vector<64x64xf32>
    %cst_16 = arith.constant dense<0.000000e+00> : vector<1x64xf32>
    %36 = tpu.matmul %34, %35, %cst_16 {dimension_numbers = #tpu.dot_dimension_numbers<[1], [0], [0], [1], [0, 0, 1, 1], [], []>} : vector<1x64xf32>, vector<64x64xf32>, vector<1x64xf32> -> vector<1x64xf32>
    %cst_17 = arith.constant 0.001953125 : f32
    %37 = vector.broadcast %cst_17 : f32 to vector<1x64xf32>
    %38 = arith.mulf %36, %37 : vector<1x64xf32>
    %cst_18 = arith.constant 9.99999974E-6 : f32
    %39 = vector.broadcast %cst_18 : f32 to vector<1x64xf32>
    %40 = arith.addf %38, %39 : vector<1x64xf32>
    %41 = math.rsqrt %40 : vector<1x64xf32>
    %42 = vector.broadcast %41 : vector<1x64xf32> to vector<32x64xf32>
    %43 = arith.mulf %31, %42 : vector<32x64xf32>
    %44 = vector.broadcast %22 : vector<1x64xf32> to vector<32x64xf32>
    %45 = arith.mulf %43, %44 : vector<32x64xf32>
    %46 = vector.broadcast %23 : vector<1x64xf32> to vector<32x64xf32>
    %47 = arith.addf %45, %46 : vector<32x64xf32>
    %48 = math.tanh %47 : vector<32x64xf32>
    %c1_i32_19 = arith.constant 1 : i32
    %49 = tpu.dynamic_rotate %48 by %c1_i32_19 dim 0 : vector<32x64xf32>, i32 -> vector<32x64xf32>
    %cst_20 = arith.constant 0.000000e+00 : f32
    %50 = vector.shape_cast %18 : vector<32x1xi1> to vector<32x1xi1>
    %51 = vector.broadcast %50 : vector<32x1xi1> to vector<32x64xi1>
    %52 = vector.broadcast %cst_20 : f32 to vector<32x64xf32>
    %53 = arith.select %51, %52, %49 : vector<32x64xi1>, vector<32x64xf32>
    %c0_21 = arith.constant 0 : index
    %c0_22 = arith.constant 0 : index
    %c0_23 = arith.constant 0 : index
    %54 = vector.load %arg4[%c0_21, %c0_22, %c0_23] : memref<3x64x128xf32, #tpu.memory_space<vmem>>, vector<1x64x128xf32>
    %55 = vector.shape_cast %54 : vector<1x64x128xf32> to vector<64x128xf32>
    %cst_24 = arith.constant dense<0.000000e+00> : vector<32x128xf32>
    %56 = tpu.matmul %53, %55, %cst_24 {dimension_numbers = #tpu.dot_dimension_numbers<[1], [0], [0], [1], [0, 0, 1, 1], [], []>} : vector<32x64xf32>, vector<64x128xf32>, vector<32x128xf32> -> vector<32x128xf32>
    %c1 = arith.constant 1 : index
    %c0_25 = arith.constant 0 : index
    %c0_26 = arith.constant 0 : index
    %57 = vector.load %arg4[%c1, %c0_25, %c0_26] : memref<3x64x128xf32, #tpu.memory_space<vmem>>, vector<1x64x128xf32>
    %58 = vector.shape_cast %57 : vector<1x64x128xf32> to vector<64x128xf32>
    %cst_27 = arith.constant dense<0.000000e+00> : vector<32x128xf32>
    %59 = tpu.matmul %48, %58, %cst_27 {dimension_numbers = #tpu.dot_dimension_numbers<[1], [0], [0], [1], [0, 0, 1, 1], [], []>} : vector<32x64xf32>, vector<64x128xf32>, vector<32x128xf32> -> vector<32x128xf32>
    %60 = arith.addf %56, %59 : vector<32x128xf32>
    %c31_i32 = arith.constant 31 : i32
    %61 = tpu.dynamic_rotate %48 by %c31_i32 dim 0 : vector<32x64xf32>, i32 -> vector<32x64xf32>
    %cst_28 = arith.constant 0.000000e+00 : f32
    %62 = vector.shape_cast %20 : vector<32x1xi1> to vector<32x1xi1>
    %63 = vector.broadcast %62 : vector<32x1xi1> to vector<32x64xi1>
    %64 = vector.broadcast %cst_28 : f32 to vector<32x64xf32>
    %65 = arith.select %63, %64, %61 : vector<32x64xi1>, vector<32x64xf32>
    %c2 = arith.constant 2 : index
    %c0_29 = arith.constant 0 : index
    %c0_30 = arith.constant 0 : index
    %66 = vector.load %arg4[%c2, %c0_29, %c0_30] : memref<3x64x128xf32, #tpu.memory_space<vmem>>, vector<1x64x128xf32>
    %67 = vector.shape_cast %66 : vector<1x64x128xf32> to vector<64x128xf32>
    %cst_31 = arith.constant dense<0.000000e+00> : vector<32x128xf32>
    %68 = tpu.matmul %65, %67, %cst_31 {dimension_numbers = #tpu.dot_dimension_numbers<[1], [0], [0], [1], [0, 0, 1, 1], [], []>} : vector<32x64xf32>, vector<64x128xf32>, vector<32x128xf32> -> vector<32x128xf32>
    %69 = arith.addf %60, %68 : vector<32x128xf32>
    %c0_32 = arith.constant 0 : index
    %c0_33 = arith.constant 0 : index
    %70 = vector.load %arg5[%c0_32, %c0_33] : memref<1x128xf32, #tpu.memory_space<vmem>>, vector<1x128xf32>
    %c0_34 = arith.constant 0 : index
    %c0_35 = arith.constant 0 : index
    %71 = vector.load %arg6[%c0_34, %c0_35] : memref<1x128xf32, #tpu.memory_space<vmem>>, vector<1x128xf32>
    %cst_36 = arith.constant dense<0.000000e+00> : vector<128xf32>
    %72 = vector.multi_reduction <add>, %69, %cst_36 [0] : vector<32x128xf32> to vector<128xf32>
    %73 = vector.shape_cast %72 : vector<128xf32> to vector<1x128xf32>
    %c0_37 = arith.constant 0 : index
    %c0_38 = arith.constant 0 : index
    %74 = vector.load %arg7[%c0_37, %c0_38] : memref<128x128xf32, #tpu.memory_space<vmem>>, vector<128x128xf32>
    %cst_39 = arith.constant dense<0.000000e+00> : vector<1x128xf32>
    %75 = tpu.matmul %73, %74, %cst_39 {dimension_numbers = #tpu.dot_dimension_numbers<[1], [0], [0], [1], [0, 0, 1, 1], [], []>} : vector<1x128xf32>, vector<128x128xf32>, vector<1x128xf32> -> vector<1x128xf32>
    %cst_40 = arith.constant 0.001953125 : f32
    %76 = vector.broadcast %cst_40 : f32 to vector<1x128xf32>
    %77 = arith.mulf %75, %76 : vector<1x128xf32>
    %78 = vector.broadcast %77 : vector<1x128xf32> to vector<32x128xf32>
    %79 = arith.subf %69, %78 : vector<32x128xf32>
    %80 = arith.mulf %79, %79 : vector<32x128xf32>
    %cst_41 = arith.constant dense<0.000000e+00> : vector<128xf32>
    %81 = vector.multi_reduction <add>, %80, %cst_41 [0] : vector<32x128xf32> to vector<128xf32>
    %82 = vector.shape_cast %81 : vector<128xf32> to vector<1x128xf32>
    %c0_42 = arith.constant 0 : index
    %c0_43 = arith.constant 0 : index
    %83 = vector.load %arg7[%c0_42, %c0_43] : memref<128x128xf32, #tpu.memory_space<vmem>>, vector<128x128xf32>
    %cst_44 = arith.constant dense<0.000000e+00> : vector<1x128xf32>
    %84 = tpu.matmul %82, %83, %cst_44 {dimension_numbers = #tpu.dot_dimension_numbers<[1], [0], [0], [1], [0, 0, 1, 1], [], []>} : vector<1x128xf32>, vector<128x128xf32>, vector<1x128xf32> -> vector<1x128xf32>
    %cst_45 = arith.constant 0.001953125 : f32
    %85 = vector.broadcast %cst_45 : f32 to vector<1x128xf32>
    %86 = arith.mulf %84, %85 : vector<1x128xf32>
    %cst_46 = arith.constant 9.99999974E-6 : f32
    %87 = vector.broadcast %cst_46 : f32 to vector<1x128xf32>
    %88 = arith.addf %86, %87 : vector<1x128xf32>
    %89 = math.rsqrt %88 : vector<1x128xf32>
    %90 = vector.broadcast %89 : vector<1x128xf32> to vector<32x128xf32>
    %91 = arith.mulf %79, %90 : vector<32x128xf32>
    %92 = vector.broadcast %70 : vector<1x128xf32> to vector<32x128xf32>
    %93 = arith.mulf %91, %92 : vector<32x128xf32>
    %94 = vector.broadcast %71 : vector<1x128xf32> to vector<32x128xf32>
    %95 = arith.addf %93, %94 : vector<32x128xf32>
    %96 = math.tanh %95 : vector<32x128xf32>
    %c0_47 = arith.constant 0 : index
    %c0_48 = arith.constant 0 : index
    %97 = vector.load %arg9[%c0_47, %c0_48] : memref<1x128xf32, #tpu.memory_space<vmem>>, vector<1x128xf32>
    %c1_i32_49 = arith.constant 1 : i32
    %98 = tpu.dynamic_rotate %96 by %c1_i32_49 dim 0 : vector<32x128xf32>, i32 -> vector<32x128xf32>
    %cst_50 = arith.constant 0.000000e+00 : f32
    %99 = vector.shape_cast %18 : vector<32x1xi1> to vector<32x1xi1>
    %100 = vector.broadcast %99 : vector<32x1xi1> to vector<32x128xi1>
    %101 = vector.broadcast %cst_50 : f32 to vector<32x128xf32>
    %102 = arith.select %100, %101, %98 : vector<32x128xi1>, vector<32x128xf32>
    %c0_51 = arith.constant 0 : index
    %c0_52 = arith.constant 0 : index
    %c0_53 = arith.constant 0 : index
    %103 = vector.load %arg8[%c0_51, %c0_52, %c0_53] : memref<3x128x128xf32, #tpu.memory_space<vmem>>, vector<1x128x128xf32>
    %104 = vector.shape_cast %103 : vector<1x128x128xf32> to vector<128x128xf32>
    %cst_54 = arith.constant dense<0.000000e+00> : vector<32x128xf32>
    %105 = tpu.matmul %102, %104, %cst_54 {dimension_numbers = #tpu.dot_dimension_numbers<[1], [0], [0], [1], [0, 0, 1, 1], [], []>} : vector<32x128xf32>, vector<128x128xf32>, vector<32x128xf32> -> vector<32x128xf32>
    %c1_55 = arith.constant 1 : index
    %c0_56 = arith.constant 0 : index
    %c0_57 = arith.constant 0 : index
    %106 = vector.load %arg8[%c1_55, %c0_56, %c0_57] : memref<3x128x128xf32, #tpu.memory_space<vmem>>, vector<1x128x128xf32>
    %107 = vector.shape_cast %106 : vector<1x128x128xf32> to vector<128x128xf32>
    %cst_58 = arith.constant dense<0.000000e+00> : vector<32x128xf32>
    %108 = tpu.matmul %96, %107, %cst_58 {dimension_numbers = #tpu.dot_dimension_numbers<[1], [0], [0], [1], [0, 0, 1, 1], [], []>} : vector<32x128xf32>, vector<128x128xf32>, vector<32x128xf32> -> vector<32x128xf32>
    %109 = arith.addf %105, %108 : vector<32x128xf32>
    %c31_i32_59 = arith.constant 31 : i32
    %110 = tpu.dynamic_rotate %96 by %c31_i32_59 dim 0 : vector<32x128xf32>, i32 -> vector<32x128xf32>
    %cst_60 = arith.constant 0.000000e+00 : f32
    %111 = vector.shape_cast %20 : vector<32x1xi1> to vector<32x1xi1>
    %112 = vector.broadcast %111 : vector<32x1xi1> to vector<32x128xi1>
    %113 = vector.broadcast %cst_60 : f32 to vector<32x128xf32>
    %114 = arith.select %112, %113, %110 : vector<32x128xi1>, vector<32x128xf32>
    %c2_61 = arith.constant 2 : index
    %c0_62 = arith.constant 0 : index
    %c0_63 = arith.constant 0 : index
    %115 = vector.load %arg8[%c2_61, %c0_62, %c0_63] : memref<3x128x128xf32, #tpu.memory_space<vmem>>, vector<1x128x128xf32>
    %116 = vector.shape_cast %115 : vector<1x128x128xf32> to vector<128x128xf32>
    %cst_64 = arith.constant dense<0.000000e+00> : vector<32x128xf32>
    %117 = tpu.matmul %114, %116, %cst_64 {dimension_numbers = #tpu.dot_dimension_numbers<[1], [0], [0], [1], [0, 0, 1, 1], [], []>} : vector<32x128xf32>, vector<128x128xf32>, vector<32x128xf32> -> vector<32x128xf32>
    %118 = arith.addf %109, %117 : vector<32x128xf32>
    %119 = vector.broadcast %97 : vector<1x128xf32> to vector<32x128xf32>
    %120 = arith.addf %118, %119 : vector<32x128xf32>
    %c0_65 = arith.constant 0 : index
    %c0_66 = arith.constant 0 : index
    %121 = vector.load %arg10[%c0_65, %c0_66] : memref<32x128xf32, #tpu.memory_space<vmem>>, vector<32x128xf32>
    tpu.vector_store %arg10[%c0_65, %c0_66], %120 {strides = array<i32>} : memref<32x128xf32, #tpu.memory_space<vmem>>, vector<32x128xf32>,
    return
  }
}

</mosaic_0001>

<bundles_post_ra>
// kernel: encode_block_pallas.1
= control target key start
LH: loop header
LB: loop body
LE: loop exit
PB: predicated region body
PF: predicated region fallthrough
CT: control target
= control target key end

     0   :  { %15 = vsyncpa [#allocation3], 0  ;;  %s1324_s0 = inlined_call_operand.vmem [shape: f32[32,64], index: 0, kind: input, shape index: {}]   ;;  %s1325_s1 = inlined_call_operand.vmem [shape: f32[1,64], index: 1, kind: input, shape index: {}]   ;;  %s1326_s2 = inlined_call_operand.vmem [shape: f32[1,64], index: 2, kind: input, shape index: {}]   ;;  %s1327_s3 = inlined_call_operand.hbm [shape: f32[64,64], index: 3, kind: input, shape index: {}]   ;;  %s1328_s4 = inlined_call_operand.hbm [shape: f32[3,64,128], index: 4, kind: input, shape index: {}]   ;;  %s1329_s5 = inlined_call_operand.vmem [shape: f32[1,128], index: 5, kind: input, shape index: {}]   ;;  %s1330_s6 = inlined_call_operand.vmem [shape: f32[1,128], index: 6, kind: input, shape index: {}]   ;;  %s1331_s7 = inlined_call_operand.vmem [shape: f32[128,128], index: 7, kind: input, shape index: {}]   ;;  %s1332_s8 = inlined_call_operand.vmem [shape: f32[3,128,128], index: 8, kind: input, shape index: {}]   ;;  %s1333_s9 = inlined_call_operand.vmem [shape: f32[1,128], index: 9, kind: input, shape index: {}]   ;;  %s1334_s10 = inlined_call_operand.vmem [shape: f32[32,128], index: 10, kind: output, shape index: {}]  }
   0x1   :  { %s27_s15 = sshll.u32 %s1327_s3, 4  ;;  %s28_s15 = int_to_ptr.hbm [resolvable:$true] %s27_s15 }
   0x2   :  { %16 = vsyncpa [#allocation5], 0  ;;  %s894_s16 = smov [#allocation2]   ;;  %s40_s20 = sshll.u32 %s1328_s4, 4  ;;  %s41_s20 = int_to_ptr.hbm [resolvable:$true] %s40_s20 }
   0x3   :  { %s29_s17 = sshll.u32 %s894_s16, 4  ;;  %s895_s21 = smov 128   ;;  %s30_s17 = int_to_ptr.vmem [resolvable:$true] %s29_s17 }
   0x4   :  { %s896_s22 = smov 8   ;;  %s897_s23 = smov [#allocation4]  }
   0x5   :  { %35 = dma.hbm_to_vmem [thread:$0]  %s28_s15, 1024, %s30_s17, [#allocation3], %s895_s21, %s895_s21, %s896_s22  }
   0x6   :  { %s42_s24 = sshll.u32 %s897_s23, 4  ;;  %s43_s24 = int_to_ptr.vmem [resolvable:$true] %s42_s24 }
   0x7   :  { %48 = dma.hbm_to_vmem [thread:$0]  %s41_s20, 3072, %s43_s24, [#allocation5], %s895_s21, %s895_s21, %s896_s22  }
   0x8   :  { %890 = dma.done.wait [#allocation3], 1024  }
   0x9   :  { %891 = vsyncadd [#allocation3], 4294966272 }
   0xa   :  { %892 = dma.done.wait [#allocation5], 3072  }
   0xb   :  { %893 = vsyncadd [#allocation5], 4294964224  ;;  %v155_v0 = vld [vmem:[#allocation2 + $0x38] sm:$0xff]  ;;  %v154_v1 = vld [vmem:[#allocation2 + $0x30] sm:$0xff]  ;;  %vm134_vm0 = vcmask 523264  }
   0xc   :  { %167 = vmatpush.msra.mxu0 %v155_v0  ;;  %213 = vmatpush.msra.mxu1 %v155_v0  ;;  %v153_v2 = vld [vmem:[#allocation2 + $0x28] sm:$0xff]  ;;  %v128_v3 = vld [vmem:[%s1324_s0] sm:$0xff]  ;;  %v130_v5 = vld [vmem:[%s1324_s0 + $0x10] sm:$0xff] }
   0xd   :  { %v129_v4 = vld [vmem:[%s1324_s0 + $0x8] sm:$0xff]  ;;  %v131_v6 = vld [vmem:[%s1324_s0 + $0x18] sm:$0xff]  ;;  %v135_v7 = vsel %vm134_vm0, %v128_v3, 0.0  ;;  %v152_v8 = vld [vmem:[#allocation2 + $0x20] sm:$0xff]  ;;  %v138_v10 = vsel %vm134_vm0, %v130_v5, 0.0 }
   0xe   :  { %168 = vmatpush.msra.mxu0 %v154_v1  ;;  %214 = vmatpush.msra.mxu1 %v154_v1  ;;  %v136_v9 = vsel %vm134_vm0, %v129_v4, 0.0  ;;  %v151_v12 = vld [vmem:[#allocation2 + $0x18] sm:$0xff]  ;;  %v140_v13 = vsel %vm134_vm0, %v131_v6, 0.0  ;;  %v150_v15 = vld [vmem:[#allocation2 + $0x10] sm:$0xff]  ;;  %v149_v17 = vld [vmem:[#allocation2 + $0x8] sm:$0xff] }
   0xf   :  { %v137_v11 = vadd.f32 %v136_v9, %v135_v7  ;;  %v148_v19 = vld [vmem:[#allocation2] sm:$0xff]  ;;  %v297_v49 = vld [vmem:[#allocation4 + $0x78] sm:$0xff]  ;;  %v296_v50 = vld [vmem:[#allocation4 + $0x70] sm:$0xff] }
  0x10   :  { %169 = vmatpush.msra.mxu0 %v153_v2  ;;  %215 = vmatpush.msra.mxu1 %v153_v2  ;;  %v409_v51 = vld [vmem:[#allocation4 + $0xb8] sm:$0xff]  ;;  %v295_v52 = vld [vmem:[#allocation4 + $0x68] sm:$0xff]  ;;  %v408_v54 = vld [vmem:[#allocation4 + $0xb0] sm:$0xff] }
  0x11   :  { %v139_v14 = vadd.f32 %v138_v10, %v137_v11  ;;  %318 = vmatpush.msra.mxu2 %v297_v49  ;;  %v288_v53 = vld [vmem:[#allocation4 + $0x38] sm:$0xff]  ;;  %v294_v55 = vld [vmem:[#allocation4 + $0x60] sm:$0xff]  ;;  %v287_v56 = vld [vmem:[#allocation4 + $0x30] sm:$0xff] }
  0x12   :  { %170 = vmatpush.msra.mxu0 %v152_v8  ;;  %216 = vmatpush.msra.mxu1 %v152_v8  ;;  %v407_v57 = vld [vmem:[#allocation4 + $0xa8] sm:$0xff]  ;;  %v293_v59 = vld [vmem:[#allocation4 + $0x58] sm:$0xff]  ;;  %v406_v62 = vld [vmem:[#allocation4 + $0xa0] sm:$0xff] }
  0x13   :  { %v141_v16 = vadd.f32 %v140_v13, %v139_v14  ;;  %319 = vmatpush.msra.mxu2 %v296_v50  ;;  %359 = vmatpush.msra.mxu3 %v288_v53  ;;  %v286_v60 = vld [vmem:[#allocation4 + $0x28] sm:$0xff]  ;;  %v292_v63 = vld [vmem:[#allocation4 + $0x50] sm:$0xff]  ;;  %v285_v0 = vld [vmem:[#allocation4 + $0x20] sm:$0xff] }
  0x14   :  { %171 = vmatpush.msra.mxu0 %v151_v12  ;;  %217 = vmatpush.msra.mxu1 %v151_v12  ;;  %v405_v1 = vld [vmem:[#allocation4 + $0x98] sm:$0xff]  ;;  %v291_v2 = vld [vmem:[#allocation4 + $0x48] sm:$0xff]  ;;  %v283_v7 = vld [vmem:[#allocation4 + $0x10] sm:$0xff] }
  0x15   :  { %v142_v18 = vrot.slane %v141_v16, 4  ;;  %320 = vmatpush.msra.mxu2 %v295_v52  ;;  %360 = vmatpush.msra.mxu3 %v287_v56  ;;  %v403_v8 = vld [vmem:[#allocation4 + $0x88] sm:$0xff]  ;;  %v402_v10 = vld [vmem:[#allocation4 + $0x80] sm:$0xff] }
  0x16   :  { %172 = vmatpush.msra.mxu0 %v150_v15  ;;  %218 = vmatpush.msra.mxu1 %v150_v15  ;;  %v282_v9 = vld [vmem:[#allocation4 + $0x8] sm:$0xff]  ;;  %v281_v11 = vld [vmem:[#allocation4] sm:$0xff] }
  0x17   :  { %v143_v20 = vadd.f32 %v142_v18, %v141_v16  ;;  %321 = vmatpush.msra.mxu2 %v294_v55  ;;  %361 = vmatpush.msra.mxu3 %v286_v60 }
  0x18   :  { %173 = vmatpush.msra.mxu0 %v149_v17  ;;  %219 = vmatpush.msra.mxu1 %v149_v17 }
  0x19   :  { %v144_v21 = vrot.slane %v143_v20, 2  ;;  %322 = vmatpush.msra.mxu2 %v293_v59  ;;  %362 = vmatpush.msra.mxu3 %v285_v0 }
  0x1a   :  { %174 = vmatpush.msra.mxu0 %v148_v19  ;;  %220 = vmatpush.msra.mxu1 %v148_v19 }
  0x1b   :  { %v145_v22 = vadd.f32 %v144_v21, %v143_v20  ;;  %323 = vmatpush.msra.mxu2 %v292_v63  ;;  %v817_v20 = vld [vmem:[%s1325_s1] ss:$0 sm:$0xff] }
  0x1c   :  { %430 = vmatpush.msrb.mxu0 %v409_v51 }
  0x1d   :  { %v146_v23 = vrot.slane %v145_v22, 1  ;;  %324 = vmatpush.msra.mxu2 %v291_v2 }
  0x1e   :  { %431 = vmatpush.msrb.mxu0 %v408_v54 }
  0x1f   :  { %v147_v24 = vadd.f32 %v146_v23, %v145_v22 }
  0x20   :  { %432 = vmatpush.msrb.mxu0 %v407_v57 }
  0x21   :  { %759 = vmatmul.msk.f32.vlgmr.msra.gmra.mxu0 %vm134_vm0, %v147_v24 }
  0x22   :  { %433 = vmatpush.msrb.mxu0 %v406_v62 }
  0x24   :  { %434 = vmatpush.msrb.mxu0 %v405_v1 }
  0x9e   :  { %v176_v25 = vpop.f32.mrf.mxu0 }
  0x9f   :  { %v179_v26 = vmul.f32 0.001953125, %v176_v25  ;;  %v818_v25 = vld [vmem:[%s1326_s2] ss:$0 sm:$0xff] }
  0xa1   :  { %v180_v27 = vperm.slane %v179_v26, 0 }
  0xa3   :  { %v976_v28 = vsub.f32 %v128_v3, %v180_v27  ;;  %v978_v29 = vsub.f32 %v129_v4, %v180_v27  ;;  %v980_v30 = vsub.f32 %v130_v5, %v180_v27  ;;  %v982_v31 = vsub.f32 %v131_v6, %v180_v27  ;;  %v284_v3 = vld [vmem:[#allocation4 + $0x18] sm:$0xff]  ;;  %v404_v5 = vld [vmem:[#allocation4 + $0x90] sm:$0xff]  ;;  %v290_v6 = vld [vmem:[#allocation4 + $0x40] sm:$0xff] }
  0xa4   :  { %363 = vmatpush.msra.mxu3 %v284_v3  ;;  %435 = vmatpush.msrb.mxu0 %v404_v5 }
  0xa5   :  { %v185_v32 = vmul.f32 %v976_v28, %v976_v28  ;;  %v186_v33 = vmul.f32 %v978_v29, %v978_v29  ;;  %v187_v34 = vmul.f32 %v980_v30, %v980_v30  ;;  %v188_v35 = vmul.f32 %v982_v31, %v982_v31  ;;  %325 = vmatpush.msra.mxu2 %v290_v6 }
  0xa6   :  { %364 = vmatpush.msra.mxu3 %v283_v7  ;;  %436 = vmatpush.msrb.mxu0 %v403_v8  ;;  %v481_v7 = vld [vmem:[%s1331_s7 + $0x78] sm:$0xff]  ;;  %v480_v8 = vld [vmem:[%s1331_s7 + $0x70] sm:$0xff] }
  0xa7   :  { %v189_v36 = vsel %vm134_vm0, %v185_v32, 0.0  ;;  %v190_v37 = vsel %vm134_vm0, %v186_v33, 0.0  ;;  %v192_v39 = vsel %vm134_vm0, %v187_v34, 0.0  ;;  %v194_v41 = vsel %vm134_vm0, %v188_v35, 0.0  ;;  %482 = vmatpush.msrb.mxu2 %v481_v7 }
  0xa8   :  { %v191_v38 = vadd.f32 %v190_v37, %v189_v36  ;;  %365 = vmatpush.msra.mxu3 %v282_v9  ;;  %437 = vmatpush.msrb.mxu0 %v402_v10  ;;  %v479_v9 = vld [vmem:[%s1331_s7 + $0x68] sm:$0xff]  ;;  %v478_v10 = vld [vmem:[%s1331_s7 + $0x60] sm:$0xff] }
  0xa9   :  { %483 = vmatpush.msrb.mxu2 %v480_v8 }
  0xaa   :  { %v193_v40 = vadd.f32 %v192_v39, %v191_v38  ;;  %366 = vmatpush.msra.mxu3 %v281_v11  ;;  %v477_v11 = vld [vmem:[%s1331_s7 + $0x58] sm:$0xff] }
  0xab   :  { %484 = vmatpush.msrb.mxu2 %v479_v9 }
  0xac   :  { %v195_v42 = vadd.f32 %v194_v41, %v193_v40 }
  0xad   :  { %485 = vmatpush.msrb.mxu2 %v478_v10 }
  0xae   :  { %v196_v43 = vrot.slane %v195_v42, 4 }
  0xaf   :  { %486 = vmatpush.msrb.mxu2 %v477_v11 }
  0xb0   :  { %v197_v44 = vadd.f32 %v196_v43, %v195_v42 }
  0xb2   :  { %v198_v45 = vrot.slane %v197_v44, 2 }
  0xb4   :  { %v199_v46 = vadd.f32 %v198_v45, %v197_v44 }
  0xb6   :  { %v200_v47 = vrot.slane %v199_v46, 1 }
  0xb8   :  { %v201_v48 = vadd.f32 %v200_v47, %v199_v46 }
  0xba   :  { %760 = vmatmul.msk.f32.vlgmr.msra.gmra.mxu1 %vm134_vm0, %v201_v48 }
 0x137   :  { %v222_v58 = vpop.f32.mrf.mxu1 }
 0x138   :  { %v225_v61 = vmul.f32 0.001953125, %v222_v58 }
 0x13a   :  { %v226_v4 = vadd.f32 1e-05, %v225_v61 }
 0x13c   :  { %822 = vrsqrt.f32 %v226_v4  ;;  %vm233_vm2 = vweird.f32 %v226_v4 }
 0x142   :  { %v823_v12 = vpop.eup %822 }
 0x143   :  { %v228_v13 = vmul.f32 %v823_v12, %v226_v4  ;;  %vm234_vm1 = vweird.f32 %v823_v12 }
 0x144   :  { %vm235_vm3 = vmor %vm233_vm2, %vm234_vm1 }
 0x145   :  { %v229_v14 = vmul.f32 %v823_v12, %v228_v13  ;;  %v475_v13 = vld [vmem:[%s1331_s7 + $0x48] sm:$0xff] }
 0x147   :  { %v230_v15 = vmul.f32 0.5, %v229_v14  ;;  %v474_v14 = vld [vmem:[%s1331_s7 + $0x40] sm:$0xff] }
 0x149   :  { %v231_v16 = vsub.f32 1.5, %v230_v15  ;;  %v473_v15 = vld [vmem:[%s1331_s7 + $0x38] sm:$0xff] }
 0x14b   :  { %v232_v17 = vmul.f32 %v823_v12, %v231_v16 }
 0x14d   :  { %v236_v18 = vsel %vm235_vm3, %v823_v12, %v232_v17  ;;  %v476_v12 = vld [vmem:[%s1331_s7 + $0x50] sm:$0xff] }
 0x14e   :  { %v237_v19 = vperm.slane %v236_v18, 0  ;;  %487 = vmatpush.msrb.mxu2 %v476_v12  ;;  %v472_v18 = vld [vmem:[%s1331_s7 + $0x30] sm:$0xff] }
 0x150   :  { %v238_v21 = vmul.f32 %v237_v19, %v976_v28  ;;  %v239_v22 = vmul.f32 %v237_v19, %v978_v29  ;;  %v240_v23 = vmul.f32 %v237_v19, %v980_v30  ;;  %v241_v24 = vmul.f32 %v237_v19, %v982_v31  ;;  %488 = vmatpush.msrb.mxu2 %v475_v13  ;;  %v471_v19 = vld [vmem:[%s1331_s7 + $0x28] sm:$0xff] }
 0x151   :  { %v67_v28 = vlaneseq }
 0x152   :  { %v246_v26 = vmul.f32 %v817_v20, %v239_v22  ;;  %v247_v27 = vmul.f32 %v817_v20, %v240_v23  ;;  %v248_v32 = vmul.f32 %v817_v20, %v241_v24  ;;  %v245_v33 = vmul.f32 %v817_v20, %v238_v21  ;;  %489 = vmatpush.msrb.mxu2 %v474_v14  ;;  %v470_v21 = vld [vmem:[%s1331_s7 + $0x20] sm:$0xff]  ;;  %v469_v22 = vld [vmem:[%s1331_s7 + $0x18] sm:$0xff]  ;;  %v468_v23 = vld [vmem:[%s1331_s7 + $0x10] sm:$0xff] }
 0x153   :  { %v1007_v29 = vshrl.u32 %v67_v28, 7 }
 0x154   :  { %v253_v34 = vadd.f32 %v818_v25, %v246_v26  ;;  %v255_v35 = vadd.f32 %v818_v25, %v248_v32  ;;  %v252_v36 = vadd.f32 %v818_v25, %v245_v33  ;;  %v254_v37 = vadd.f32 %v818_v25, %v247_v27  ;;  %490 = vmatpush.msrb.mxu2 %v473_v15  ;;  %v467_v25 = vld [vmem:[%s1331_s7 + $0x8] sm:$0xff]  ;;  %v466_v27 = vld [vmem:[%s1331_s7] sm:$0xff] }
 0x155   :  { %v76_v31 = vand.u32 15, %v1007_v29  ;;  %vm384_vm4 = vcmp.lt.s32.totalorder %v1007_v29, 7  ;;  %vm264_vm5 = vcmp.lt.s32.totalorder %v1007_v29, 1  ;;  %v69_v42 = vadd.s32 8, %v1007_v29 }
 0x156   :  { %824 = vtanh.f32 %v253_v34  ;;  %v70_v55 = vadd.s32 16, %v1007_v29  ;;  %v71_v61 = vadd.s32 24, %v1007_v29  ;;  %491 = vmatpush.msrb.mxu2 %v472_v18 }
 0x157   :  { %826 = vtanh.f32 %v255_v35  ;;  %vm1014_vm6 = vcmp.eq.s32.totalorder %v76_v31, 0  ;;  %v83_v50 = vand.u32 15, %v69_v42 }
 0x158   :  { %828 = vtanh.f32 %v252_v36  ;;  %v90_v58 = vand.u32 15, %v70_v55  ;;  %v97_v2 = vand.u32 15, %v71_v61  ;;  %492 = vmatpush.msrb.mxu2 %v471_v19  ;;  %vm789_vm13 = vmneg %vm1014_vm6 }
 0x159   :  { %830 = vtanh.f32 %v254_v37  ;;  %vm1026_vm7 = vcmp.eq.s32.totalorder %v83_v50, 15 }
 0x15a   :  { %vm1042_vm8 = vcmp.eq.s32.totalorder %v90_v58, 0  ;;  %vm1054_vm9 = vcmp.eq.s32.totalorder %v97_v2, 15  ;;  %493 = vmatpush.msrb.mxu2 %v470_v21  ;;  %vm809_vm14 = vmneg %vm1026_vm7 }
 0x15b   :  { %vm791_vm15 = vmneg %vm1042_vm8 }
 0x15c   :  { %v825_v30 = vpop.eup %824  ;;  %494 = vmatpush.msrb.mxu2 %v469_v22 }
 0x15d   :  { %v827_v38 = vpop.eup %826  ;;  %v381_v39 = vrot.slane %v825_v30, 1  ;;  %v261_v54 = vrot.slane %v825_v30, 7 }
 0x15e   :  { %v829_v40 = vpop.eup %828  ;;  %v263_v41 = vrot.slane %v827_v38, 7  ;;  %v383_v60 = vrot.slane %v827_v38, 1  ;;  %495 = vmatpush.msrb.mxu2 %v468_v23 }
 0x15f   :  { %v831_v43 = vpop.eup %830  ;;  %761 = vmatmul.msk.f32.vlgmr.msra.gmra.mxu2 %vm134_vm0, %v829_v40  ;;  %v380_v44 = vrot.slane %v829_v40, 1  ;;  %v260_v46 = vrot.slane %v829_v40, 7 }
 0x160   :  { %v382_v51 = vrot.slane %v831_v43, 1  ;;  %v262_v59 = vrot.slane %v831_v43, 7  ;;  %496 = vmatpush.msrb.mxu2 %v467_v25 }
 0x161   :  { %v387_v47 = vsel %vm384_vm4, %v380_v44, %v381_v39  ;;  %v268_v48 = vsel %vm264_vm5, %v263_v41, %v260_v46  ;;  %v267_v57 = vsel %vm264_vm5, %v260_v46, %v261_v54  ;;  %v388_v4 = vsel %vm384_vm4, %v383_v60, %v380_v44 }
 0x162   :  { %769 = vmatmul.msk.f32.vlgmr.msrb.gmra.mxu0 %vm134_vm0, %v387_v47  ;;  %v277_v49 = vsel %vm1014_vm6, 0.0, %v268_v48  ;;  %v386_v53 = vsel %vm384_vm4, %v381_v39, %v382_v51  ;;  %v266_v63 = vsel %vm264_vm5, %v261_v54, %v262_v59  ;;  %v385_v0 = vsel %vm384_vm4, %v382_v51, %v383_v60  ;;  %497 = vmatpush.msrb.mxu2 %v466_v27 }
 0x163   :  { %765 = vmatmul.msk.f32.vlgmr.msra.gmra.mxu3 %vm134_vm0, %v277_v49  ;;  %v398_v56 = vsel %vm1026_vm7, 0.0, %v386_v53  ;;  %v279_v1 = vsel %vm1042_vm8, 0.0, %v266_v63  ;;  %v400_v5 = vsel %vm1054_vm9, 0.0, %v388_v4  ;;  %v265_v6 = vsel %vm264_vm5, %v262_v59, %v263_v41 }
 0x164   :  { %521 = vmatpush.msra.mxu2 %v481_v7 }
 0x166   :  { %522 = vmatpush.msra.mxu2 %v480_v8 }
 0x167   :  { %762 = vmatmul.msk.f32.gmra.mxu2 %vm134_vm0, %v825_v30 }
 0x168   :  { %523 = vmatpush.msra.mxu2 %v479_v9 }
 0x16a   :  { %770 = vmatmul.msk.f32.gmra.mxu0 %vm134_vm0, %v398_v56  ;;  %524 = vmatpush.msra.mxu2 %v478_v10 }
 0x16b   :  { %766 = vmatmul.msk.f32.gmra.mxu3 %vm134_vm0, %v267_v57 }
 0x16c   :  { %525 = vmatpush.msra.mxu2 %v477_v11 }
 0x16e   :  { %526 = vmatpush.msra.mxu2 %v476_v12 }
 0x16f   :  { %763 = vmatmul.msk.f32.gmra.mxu2 %vm134_vm0, %v831_v43 }
 0x170   :  { %527 = vmatpush.msra.mxu2 %v475_v13  ;;  %v788_v13 = vld [vmem:[%s1332_s8 + $0xf8] sm:$0xff] }
 0x171   :  { %622 = vmatpush.msrb.mxu3 %v788_v13 }
 0x172   :  { %771 = vmatmul.msk.f32.gmra.mxu0 %vm134_vm0, %v385_v0  ;;  %528 = vmatpush.msra.mxu2 %v474_v14  ;;  %v787_v14 = vld [vmem:[%s1332_s8 + $0xf0] sm:$0xff] }
 0x173   :  { %767 = vmatmul.msk.f32.gmra.mxu3 %vm134_vm0, %v279_v1 }
 0x174   :  { %529 = vmatpush.msra.mxu2 %v473_v15  ;;  %623 = vmatpush.msrb.mxu3 %v787_v14  ;;  %v604_v15 = vld [vmem:[%s1332_s8 + $0x78] sm:$0xff] }
 0x175   :  { %651 = vmatpush.msra.mxu0 %v604_v15 }
 0x176   :  { %530 = vmatpush.msra.mxu2 %v472_v18  ;;  %v603_v18 = vld [vmem:[%s1332_s8 + $0x70] sm:$0xff] }
 0x177   :  { %764 = vmatmul.msk.f32.gmra.mxu2 %vm134_vm0, %v827_v38  ;;  %652 = vmatpush.msra.mxu0 %v603_v18 }
 0x178   :  { %531 = vmatpush.msra.mxu2 %v471_v19  ;;  %v807_v19 = vld [vmem:[%s1332_s8 + $0x170] sm:$0xff] }
 0x17a   :  { %772 = vmatmul.msk.f32.gmra.mxu0 %vm134_vm0, %v400_v5  ;;  %532 = vmatpush.msra.mxu2 %v470_v21  ;;  %v602_v21 = vld [vmem:[%s1332_s8 + $0x68] sm:$0xff] }
 0x17b   :  { %768 = vmatmul.msk.f32.gmra.mxu3 %vm134_vm0, %v265_v6  ;;  %653 = vmatpush.msra.mxu0 %v602_v21  ;;  %v820_v21 = vld [vmem:[%s1330_s6] ss:$0 sm:$0xff]  ;;  %vm811_vm0 = vmneg %vm1054_vm9 }
 0x17c   :  { %533 = vmatpush.msra.mxu2 %v469_v22  ;;  %v806_v22 = vld [vmem:[%s1332_s8 + $0x168] sm:$0xff] }
 0x17e   :  { %534 = vmatpush.msra.mxu2 %v468_v23  ;;  %v784_v23 = vld [vmem:[%s1332_s8 + $0xd8] sm:$0xff] }
 0x180   :  { %535 = vmatpush.msra.mxu2 %v467_v25  ;;  %v805_v25 = vld [vmem:[%s1332_s8 + $0x160] sm:$0xff] }
 0x182   :  { %536 = vmatpush.msra.mxu2 %v466_v27  ;;  %v600_v27 = vld [vmem:[%s1332_s8 + $0x58] sm:$0xff] }
 0x1df   :  { %v439_v16 = vpop.f32.mrf.mxu0 }
 0x1e2   :  { %v327_v17 = vpop.f32.mrf.mxu2 }
 0x1e6   :  { %v368_v20 = vpop.f32.mrf.mxu3 }
 0x1e7   :  { %v442_v26 = vpop.f32.mrf.mxu0  ;;  %v369_v37 = vadd.f32 %v368_v20, %v327_v17  ;;  %v786_v17 = vld [vmem:[%s1332_s8 + $0xe8] sm:$0xff]  ;;  %v785_v20 = vld [vmem:[%s1332_s8 + $0xe0] sm:$0xff] }
 0x1e8   :  { %624 = vmatpush.msrb.mxu3 %v786_v17  ;;  %v819_v17 = vld [vmem:[%s1329_s5] ss:$0 sm:$0xff] }
 0x1e9   :  { %v451_v31 = vadd.f32 %v439_v16, %v369_v37  ;;  %v808_v16 = vld [vmem:[%s1332_s8 + $0x178] sm:$0xff]  ;;  %v598_v37 = vld [vmem:[%s1332_s8 + $0x48] sm:$0xff] }
 0x1ea   :  { %v330_v24 = vpop.f32.mrf.mxu2  ;;  %709 = vmatpush.msrb.mxu1 %v808_v16  ;;  %625 = vmatpush.msrb.mxu3 %v785_v20 }
 0x1ec   :  { %710 = vmatpush.msrb.mxu1 %v807_v19  ;;  %626 = vmatpush.msrb.mxu3 %v784_v23 }
 0x1ee   :  { %v371_v32 = vpop.f32.mrf.mxu3  ;;  %711 = vmatpush.msrb.mxu1 %v806_v22 }
 0x1ef   :  { %v445_v34 = vpop.f32.mrf.mxu0  ;;  %v372_v36 = vadd.f32 %v371_v32, %v330_v24  ;;  %v601_v24 = vld [vmem:[%s1332_s8 + $0x60] sm:$0xff]  ;;  %v804_v32 = vld [vmem:[%s1332_s8 + $0x158] sm:$0xff] }
 0x1f0   :  { %654 = vmatpush.msra.mxu0 %v601_v24  ;;  %712 = vmatpush.msrb.mxu1 %v805_v25 }
 0x1f1   :  { %v452_v30 = vadd.f32 %v442_v26, %v372_v36  ;;  %v783_v26 = vld [vmem:[%s1332_s8 + $0xd0] sm:$0xff]  ;;  %v781_v36 = vld [vmem:[%s1332_s8 + $0xc0] sm:$0xff] }
 0x1f2   :  { %v333_v33 = vpop.f32.mrf.mxu2  ;;  %627 = vmatpush.msrb.mxu3 %v783_v26  ;;  %655 = vmatpush.msra.mxu0 %v600_v27 }
 0x1f3   :  { %v457_v41 = vadd.f32 %v452_v30, %v451_v31  ;;  %713 = vmatpush.msrb.mxu1 %v804_v32 }
 0x1f6   :  { %v374_v35 = vpop.f32.mrf.mxu3 }
 0x1f7   :  { %v375_v28 = vadd.f32 %v374_v35, %v333_v33  ;;  %v448_v43 = vpop.f32.mrf.mxu0  ;;  %v782_v33 = vld [vmem:[%s1332_s8 + $0xc8] sm:$0xff]  ;;  %v803_v35 = vld [vmem:[%s1332_s8 + $0x150] sm:$0xff] }
 0x1f8   :  { %628 = vmatpush.msrb.mxu3 %v782_v33  ;;  %714 = vmatpush.msrb.mxu1 %v803_v35 }
 0x1f9   :  { %v453_v38 = vadd.f32 %v445_v34, %v375_v28  ;;  %v599_v34 = vld [vmem:[%s1332_s8 + $0x50] sm:$0xff]  ;;  %v802_v28 = vld [vmem:[%s1332_s8 + $0x148] sm:$0xff] }
 0x1fa   :  { %v336_v39 = vpop.f32.mrf.mxu2  ;;  %656 = vmatpush.msra.mxu0 %v599_v34  ;;  %629 = vmatpush.msrb.mxu3 %v781_v36 }
 0x1fb   :  { %v458_v44 = vadd.f32 %v457_v41, %v453_v38  ;;  %715 = vmatpush.msrb.mxu1 %v802_v28  ;;  %v800_v41 = vld [vmem:[%s1332_s8 + $0x138] sm:$0xff] }
 0x1fc   :  { %657 = vmatpush.msra.mxu0 %v598_v37 }
 0x1fe   :  { %v377_v40 = vpop.f32.mrf.mxu3 }
 0x1ff   :  { %v378_v42 = vadd.f32 %v377_v40, %v336_v39  ;;  %v779_v39 = vld [vmem:[%s1332_s8 + $0xb0] sm:$0xff]  ;;  %v596_v40 = vld [vmem:[%s1332_s8 + $0x38] sm:$0xff] }
 0x201   :  { %v454_v46 = vadd.f32 %v448_v43, %v378_v42  ;;  %v778_v42 = vld [vmem:[%s1332_s8 + $0xa8] sm:$0xff]  ;;  %v595_v43 = vld [vmem:[%s1332_s8 + $0x30] sm:$0xff] }
 0x203   :  { %v459_v47 = vadd.f32 %v458_v44, %v454_v46  ;;  %v799_v44 = vld [vmem:[%s1332_s8 + $0x130] sm:$0xff] }
 0x205   :  { %v460_v48 = vrot.slane %v459_v47, 4 }
 0x207   :  { %v461_v49 = vadd.f32 %v460_v48, %v459_v47  ;;  %v594_v47 = vld [vmem:[%s1332_s8 + $0x28] sm:$0xff] }
 0x208   :  { %v798_v48 = vld [vmem:[%s1332_s8 + $0x128] sm:$0xff] }
 0x209   :  { %v462_v50 = vrot.slane %v461_v49, 2 }
 0x20b   :  { %v463_v51 = vadd.f32 %v462_v50, %v461_v49  ;;  %v776_v50 = vld [vmem:[%s1332_s8 + $0x98] sm:$0xff] }
 0x20d   :  { %v464_v53 = vrot.slane %v463_v51, 1 }
 0x20f   :  { %v465_v54 = vadd.f32 %v464_v53, %v463_v51  ;;  %v775_v53 = vld [vmem:[%s1332_s8 + $0x90] sm:$0xff] }
 0x211   :  { %498 = vmatmul.f32.vlgmr.msrb.gmra.mxu2 %v465_v54  ;;  %v593_v54 = vld [vmem:[%s1332_s8 + $0x20] sm:$0xff] }
 0x294   :  { %v499_v55 = vpop.f32.mrf.mxu2 }
 0x295   :  { %v502_v56 = vmul.f32 0.001953125, %v499_v55  ;;  %v797_v55 = vld [vmem:[%s1332_s8 + $0x120] sm:$0xff] }
 0x297   :  { %v503_v57 = vperm.slane %v502_v56, 0  ;;  %v774_v56 = vld [vmem:[%s1332_s8 + $0x88] sm:$0xff] }
 0x299   :  { %v1115_v58 = vsub.f32 %v451_v31, %v503_v57  ;;  %v1117_v59 = vsub.f32 %v452_v30, %v503_v57  ;;  %v1119_v60 = vsub.f32 %v453_v38, %v503_v57  ;;  %v1121_v61 = vsub.f32 %v454_v46, %v503_v57  ;;  %v780_v30 = vld [vmem:[%s1332_s8 + $0xb8] sm:$0xff]  ;;  %v597_v31 = vld [vmem:[%s1332_s8 + $0x40] sm:$0xff] }
 0x29a   :  { %630 = vmatpush.msrb.mxu3 %v780_v30  ;;  %v801_v38 = vld [vmem:[%s1332_s8 + $0x140] sm:$0xff]  ;;  %658 = vmatpush.msra.mxu0 %v597_v31  ;;  %v592_v57 = vld [vmem:[%s1332_s8 + $0x18] sm:$0xff] }
 0x29b   :  { %v508_v63 = vmul.f32 %v1115_v58, %v1115_v58  ;;  %v509_v0 = vmul.f32 %v1117_v59, %v1117_v59  ;;  %v510_v1 = vmul.f32 %v1119_v60, %v1119_v60  ;;  %v511_v4 = vmul.f32 %v1121_v61, %v1121_v61  ;;  %716 = vmatpush.msrb.mxu1 %v801_v38  ;;  %v777_v46 = vld [vmem:[%s1332_s8 + $0xa0] sm:$0xff] }
 0x29c   :  { %631 = vmatpush.msrb.mxu3 %v779_v39  ;;  %659 = vmatpush.msra.mxu0 %v596_v40 }
 0x29d   :  { %v512_v2 = vadd.f32 %v509_v0, %v508_v63  ;;  %717 = vmatpush.msrb.mxu1 %v800_v41  ;;  %v796_v63 = vld [vmem:[%s1332_s8 + $0x118] sm:$0xff] }
 0x29e   :  { %632 = vmatpush.msrb.mxu3 %v778_v42  ;;  %660 = vmatpush.msra.mxu0 %v595_v43 }
 0x29f   :  { %v513_v5 = vadd.f32 %v512_v2, %v510_v1  ;;  %718 = vmatpush.msrb.mxu1 %v799_v44  ;;  %v591_v1 = vld [vmem:[%s1332_s8 + $0x10] sm:$0xff] }
 0x2a0   :  { %633 = vmatpush.msrb.mxu3 %v777_v46  ;;  %661 = vmatpush.msra.mxu0 %v594_v47  ;;  %v795_v2 = vld [vmem:[%s1332_s8 + $0x110] sm:$0xff] }
 0x2a1   :  { %v514_v6 = vadd.f32 %v513_v5, %v511_v4  ;;  %719 = vmatpush.msrb.mxu1 %v798_v48  ;;  %v773_v4 = vld [vmem:[%s1332_s8 + $0x80] sm:$0xff]  ;;  %v590_v5 = vld [vmem:[%s1332_s8 + $0x8] sm:$0xff] }
 0x2a2   :  { %634 = vmatpush.msrb.mxu3 %v776_v50  ;;  %662 = vmatpush.msra.mxu0 %v593_v54  ;;  %v821_v50 = vld [vmem:[%s1333_s9] ss:$0 sm:$0xff] }
 0x2a3   :  { %v515_v7 = vrot.slane %v514_v6, 4  ;;  %720 = vmatpush.msrb.mxu1 %v797_v55 }
 0x2a4   :  { %635 = vmatpush.msrb.mxu3 %v775_v53  ;;  %663 = vmatpush.msra.mxu0 %v592_v57 }
 0x2a5   :  { %v516_v8 = vadd.f32 %v515_v7, %v514_v6  ;;  %721 = vmatpush.msrb.mxu1 %v796_v63  ;;  %v794_v6 = vld [vmem:[%s1332_s8 + $0x108] sm:$0xff]  ;;  %v589_v7 = vld [vmem:[%s1332_s8] sm:$0xff] }
 0x2a6   :  { %636 = vmatpush.msrb.mxu3 %v774_v56  ;;  %664 = vmatpush.msra.mxu0 %v591_v1 }
 0x2a7   :  { %v517_v9 = vrot.slane %v516_v8, 2  ;;  %722 = vmatpush.msrb.mxu1 %v795_v2 }
 0x2a8   :  { %637 = vmatpush.msrb.mxu3 %v773_v4  ;;  %665 = vmatpush.msra.mxu0 %v590_v5 }
 0x2a9   :  { %v518_v10 = vadd.f32 %v517_v9, %v516_v8  ;;  %723 = vmatpush.msrb.mxu1 %v794_v6  ;;  %v793_v8 = vld [vmem:[%s1332_s8 + $0x100] sm:$0xff] }
 0x2aa   :  { %666 = vmatpush.msra.mxu0 %v589_v7 }
 0x2ab   :  { %v519_v11 = vrot.slane %v518_v10, 1  ;;  %724 = vmatpush.msrb.mxu1 %v793_v8 }
 0x2ad   :  { %v520_v12 = vadd.f32 %v519_v11, %v518_v10 }
 0x2af   :  { %537 = vmatmul.f32.vlgmr.msra.gmra.mxu2 %v520_v12 }
 0x332   :  { %v538_v49 = vpop.f32.mrf.mxu2 }
 0x333   :  { %v541_v51 = vmul.f32 0.001953125, %v538_v49 }
 0x335   :  { %v542_v0 = vadd.f32 1e-05, %v541_v51 }
 0x337   :  { %832 = vrsqrt.f32 %v542_v0  ;;  %vm549_vm11 = vweird.f32 %v542_v0 }
 0x33d   :  { %v833_v9 = vpop.eup %832 }
 0x33e   :  { %v544_v10 = vmul.f32 %v833_v9, %v542_v0  ;;  %vm550_vm10 = vweird.f32 %v833_v9 }
 0x33f   :  { %vm551_vm12 = vmor %vm549_vm11, %vm550_vm10 }
 0x340   :  { %v545_v11 = vmul.f32 %v833_v9, %v544_v10 }
 0x342   :  { %v546_v12 = vmul.f32 0.5, %v545_v11 }
 0x344   :  { %v547_v13 = vsub.f32 1.5, %v546_v12 }
 0x346   :  { %v548_v14 = vmul.f32 %v833_v9, %v547_v13 }
 0x348   :  { %v552_v15 = vsel %vm551_vm12, %v833_v9, %v548_v14 }
 0x349   :  { %v553_v16 = vperm.slane %v552_v15, 0 }
 0x34b   :  { %v554_v18 = vmul.f32 %v553_v16, %v1115_v58  ;;  %v555_v19 = vmul.f32 %v553_v16, %v1117_v59  ;;  %v557_v20 = vmul.f32 %v553_v16, %v1121_v61  ;;  %v556_v22 = vmul.f32 %v553_v16, %v1119_v60 }
 0x34d   :  { %v562_v23 = vmul.f32 %v819_v17, %v555_v19  ;;  %v564_v24 = vmul.f32 %v819_v17, %v557_v20  ;;  %v561_v25 = vmul.f32 %v819_v17, %v554_v18  ;;  %v563_v32 = vmul.f32 %v819_v17, %v556_v22 }
 0x34f   :  { %v569_v26 = vadd.f32 %v820_v21, %v562_v23  ;;  %v571_v27 = vadd.f32 %v820_v21, %v564_v24  ;;  %v568_v33 = vadd.f32 %v820_v21, %v561_v25  ;;  %v570_v58 = vadd.f32 %v820_v21, %v563_v32 }
 0x351   :  { %834 = vtanh.f32 %v569_v26 }
 0x352   :  { %836 = vtanh.f32 %v571_v27 }
 0x353   :  { %838 = vtanh.f32 %v568_v33 }
 0x354   :  { %840 = vtanh.f32 %v570_v58 }
 0x357   :  { %v835_v59 = vpop.eup %834 }
 0x358   :  { %v837_v61 = vpop.eup %836  ;;  %v681_v34 = vrot.slane %v835_v59, 1  ;;  %v578_v38 = vrot.slane %v835_v59, 7 }
 0x359   :  { %v839_v35 = vpop.eup %838  ;;  %v580_v36 = vrot.slane %v837_v61, 7  ;;  %v683_v42 = vrot.slane %v837_v61, 1 }
 0x35a   :  { %638 = vmatmul.f32.vlgmr.msrb.gmra.mxu3 %v839_v35  ;;  %v577_v60 = vrot.slane %v839_v35, 7  ;;  %v680_v37 = vrot.slane %v839_v35, 1  ;;  %v841_v31 = vpop.eup %840 }
 0x35b   :  { %v682_v39 = vrot.slane %v841_v31, 1  ;;  %v579_v41 = vrot.slane %v841_v31, 7 }
 0x35c   :  { %v584_v28 = vsel %vm264_vm5, %v580_v36, %v577_v60  ;;  %v686_v30 = vsel %vm384_vm4, %v680_v37, %v681_v34  ;;  %v583_v45 = vsel %vm264_vm5, %v577_v60, %v578_v38  ;;  %v687_v46 = vsel %vm384_vm4, %v683_v42, %v680_v37 }
 0x35d   :  { %790 = vmatmul.msk.f32.vlgmr.msra.gmra.mxu0 %vm789_vm13, %v584_v28  ;;  %725 = vmatmul.f32.vlgmr.msrb.gmra.mxu1 %v686_v30  ;;  %v685_v40 = vsel %vm384_vm4, %v681_v34, %v682_v39  ;;  %v582_v43 = vsel %vm264_vm5, %v578_v38, %v579_v41  ;;  %v684_v52 = vsel %vm384_vm4, %v682_v39, %v683_v42 }
 0x35e   :  { %v581_v44 = vsel %vm264_vm5, %v579_v41, %v580_v36 }
 0x362   :  { %641 = vmatmul.f32.gmra.mxu3 %v835_v59 }
 0x365   :  { %670 = vmatmul.f32.gmra.mxu0 %v583_v45  ;;  %810 = vmatmul.msk.f32.gmra.mxu1 %vm809_vm14, %v685_v40 }
 0x36a   :  { %644 = vmatmul.f32.gmra.mxu3 %v841_v31 }
 0x36d   :  { %792 = vmatmul.msk.f32.gmra.mxu0 %vm791_vm15, %v582_v43  ;;  %731 = vmatmul.f32.gmra.mxu1 %v684_v52 }
 0x372   :  { %647 = vmatmul.f32.gmra.mxu3 %v837_v61 }
 0x375   :  { %676 = vmatmul.f32.gmra.mxu0 %v581_v44  ;;  %812 = vmatmul.msk.f32.gmra.mxu1 %vm811_vm0, %v687_v46 }
 0x3da   :  { %v668_v62 = vpop.f32.mrf.mxu0  ;;  %v726_v47 = vpop.f32.mrf.mxu1 }
 0x3dd   :  { %v639_v48 = vpop.f32.mrf.mxu3 }
 0x3de   :  { %v669_v49 = vadd.f32 %v668_v62, %v639_v48 }
 0x3e0   :  { %v738_v51 = vadd.f32 %v726_v47, %v669_v49 }
 0x3e2   :  { %v745_v53 = vadd.f32 %v821_v50, %v738_v51  ;;  %v671_v3 = vpop.f32.mrf.mxu0  ;;  %v729_v54 = vpop.f32.mrf.mxu1 }
 0x3e4   :  { %749 = vst [vmem:[%s1334_s10] sm:$0xff] %v745_v53 }
 0x3e5   :  { %v642_v29 = vpop.f32.mrf.mxu3 }
 0x3e6   :  { %v672_v55 = vadd.f32 %v671_v3, %v642_v29 }
 0x3e8   :  { %v739_v56 = vadd.f32 %v729_v54, %v672_v55 }
 0x3ea   :  { %v746_v57 = vadd.f32 %v821_v50, %v739_v56  ;;  %v674_v63 = vpop.f32.mrf.mxu0  ;;  %v732_v0 = vpop.f32.mrf.mxu1 }
 0x3ec   :  { %750 = vst [vmem:[%s1334_s10 + $0x8] sm:$0xff] %v746_v57 }
 0x3ed   :  { %v645_v1 = vpop.f32.mrf.mxu3 }
 0x3ee   :  { %v675_v2 = vadd.f32 %v674_v63, %v645_v1 }
 0x3f0   :  { %v740_v4 = vadd.f32 %v732_v0, %v675_v2 }
 0x3f2   :  { %v747_v5 = vadd.f32 %v821_v50, %v740_v4  ;;  %v677_v6 = vpop.f32.mrf.mxu0  ;;  %v735_v9 = vpop.f32.mrf.mxu1 }
 0x3f4   :  { %751 = vst [vmem:[%s1334_s10 + $0x10] sm:$0xff] %v747_v5 }
 0x3f5   :  { %v648_v7 = vpop.f32.mrf.mxu3 }
 0x3f6   :  { %v678_v8 = vadd.f32 %v677_v6, %v648_v7 }
 0x3f8   :  { %v741_v10 = vadd.f32 %v735_v9, %v678_v8 }
 0x3fa   :  { %v748_v11 = vadd.f32 %v821_v50, %v741_v10 }
 0x3fc   :  { %752 = vst [vmem:[%s1334_s10 + $0x18] sm:$0xff] %v748_v11 }
 0x3fd   :  { %757 = vsyncpa [#allocation3], 1 }
 0x3fe   :  { %758 = vsyncpa [#allocation5], 1 }

</bundles_post_ra>
